<compile_context>
chip_gen: v6e
topology: v6e:2x2x1
jax: 0.10.0
libtpu: 0.0.40
codegen_flags: <defaults>
</compile_context>

<pallas_src>
import jax
import jax.numpy as jnp
import numpy as np
from jax import lax
from jax.experimental import pallas as pl
from jax.experimental.pallas import tpu as pltpu

# l_p / l_c are module-level globals in the original model.py (undefined in the
# snippet); fix them here as deterministic constants.
L_P = 1.0
L_C = 1.0


def _const_pow(x, p):
    """pow with a Python-constant exponent (avoids exp/log pow on negatives)."""
    if p == 1.0:
        return x
    if float(p).is_integer() and p >= 0:
        r = jnp.ones_like(x)
        for _ in range(int(p)):
            r = r * x
        return r
    return jnp.power(x, p)


def _round_up(x, m):
    return ((x + m - 1) // m) * m


def policy_la_kernel(capt_ref, len_ref, idall_ref, dfall_ref, ix_ref,
                     proj_ref, b_ref, o_ref):
    # One grid step == one block of TB batch rows.
    capt = capt_ref[...]                 # (TB, beam, S) int32
    lens = len_ref[...]                  # (TB, beam, 1) int32
    TB, beam, S = capt.shape
    NC, VC = proj_ref.shape              # vocab chunks (sublanes) x chunk width (lanes)

    # caption_mask = caption_lengths > ones.cumsum(dim=2); masked positions -> token 0
    # (bug-compatible with the torch `bool * int` masking).
    pos = lax.broadcasted_iota(jnp.int32, (TB, beam, S), 2) + 1
    masked_tok = jnp.where(lens > pos, capt, 0)                  # (TB, beam, S)

    # Vocab iota for one chunk only (broadcast in the compare), hoisted.
    vid = lax.broadcasted_iota(jnp.int32, (1, 1, VC), 2)         # (1, 1, VC)

    def chunk_contrib(c, proj_c):
        # proj_c: (1, 1, VC) f32.  Fold the projection into the compare and
        # reduce immediately -- no (TB, beam, VC) accumulator survives the loop.
        tok_rel = masked_tok - c * VC                            # (TB, beam, S)
        part = jnp.zeros((TB, beam), jnp.float32)
        for s in range(S):                                       # static, S is small
            hit = (tok_rel[:, :, s:s + 1] == vid).astype(jnp.float32)
            part = part + jnp.sum(hit * proj_c, axis=2)
        return part

    if NC <= 8:
        # Small vocab: fully static chunk loop (static proj slices).
        score = jnp.zeros((TB, beam), jnp.float32)
        for c in range(NC):
            proj_c = proj_ref[c:c + 1, :].reshape(1, 1, VC)
            score = score + chunk_contrib(c, proj_c)
    else:
        # Large vocab: fori_loop keeps per-chunk temporaries' live ranges bounded.
        def body(c, score):
            proj_c = proj_ref[pl.ds(c, 1), :].reshape(1, 1, VC)
            return score + chunk_contrib(c, proj_c)
        score = lax.fori_loop(0, NC, body, jnp.zeros((TB, beam), jnp.float32))

    # Fused Linear(D, 1): score = counts . emb_proj + bias (bias via SMEM scalar).
    score = score + b_ref[0]                                     # (TB, beam)

    # idfall = dfall * (idall == ix)
    idfall = dfall_ref[...] * (idall_ref[...] == ix_ref[...]).astype(jnp.float32)

    # scores = scores**l_p * idfall**l_c ; log_softmax over beam
    s_val = _const_pow(score, L_P) * _const_pow(idfall, L_C)     # (TB, beam)
    m = jnp.max(s_val, axis=1, keepdims=True)
    z = s_val - m
    lse = jnp.log(jnp.sum(jnp.exp(z), axis=1, keepdims=True))
    o_ref[...] = z - lse


def policy_la_forward(captions, caption_lengths, logs, idall, dfall, ix,
                      emb_table, out_w, out_b, *,
                      batch_block=64, vocab_chunk=512, target_grid_steps=4):
    # NOTE: `logs` is accepted (to match the torch signature) but unused by the
    # original forward, so it is not passed to the kernel.
    del logs
    B, beam, S = captions.shape
    V, D = emb_table.shape

    # Fuse the embedding table through the Linear(D, 1) weight once, outside the
    # kernel: (V, D) @ (D, 1) -> (V,).  Only V floats ever reach VMEM.
    emb_proj = (emb_table.astype(jnp.float32)
                @ out_w.reshape(D, 1).astype(jnp.float32)).reshape(V)

    # Chunk the vocab along lanes: VC multiple of 128, zero-pad the tail chunk.
    # (Padded vocab ids are never matched by real tokens, so zeros are inert.)
    VC = min(_round_up(V, 128), _round_up(vocab_chunk, 128))
    Vp = _round_up(V, VC)
    NC = Vp // VC
    proj = jnp.zeros((Vp,), jnp.float32).at[:V].set(emb_proj).reshape(NC, VC)

    # Batch blocking: multiple grid steps for realistic B (feeds both v7x TCs via
    # the "parallel" axis and lets BlockSpec double-buffering overlap DMAs),
    # while TB stays a multiple of 8 (or full-extent for tiny B) so the 2-D
    # (TB, beam) blocks respect the (8, 128) tiling rule.
    if B < 16:
        TB = B                                   # single step; full-extent blocks
    else:
        TB = min(batch_block,
                 max(8, _round_up(-(-B // target_grid_steps), 8)))
    Bp = _round_up(B, TB)

    def pad_b(x):
        if Bp == B:
            return x
        pad = [(0, Bp - B)] + [(0, 0)] * (x.ndim - 1)
        return jnp.pad(x, pad)

    capt = pad_b(captions.astype(jnp.int32))
    lens = pad_b(caption_lengths.astype(jnp.int32))
    idall2 = pad_b(idall.astype(jnp.int32))
    dfall2 = pad_b(dfall.astype(jnp.float32))
    ix2 = pad_b(ix.reshape(B, 1).astype(jnp.int32))
    bias = out_b.reshape(1).astype(jnp.float32)

    out = pl.pallas_call(
        policy_la_kernel,
        out_shape=jax.ShapeDtypeStruct((Bp, beam), jnp.float32),
        grid=(Bp // TB,),
        in_specs=[
            pl.BlockSpec((TB, beam, S), lambda i: (i, 0, 0)),   # captions
            pl.BlockSpec((TB, beam, 1), lambda i: (i, 0, 0)),   # caption_lengths
            pl.BlockSpec((TB, beam),    lambda i: (i, 0)),      # idall
            pl.BlockSpec((TB, beam),    lambda i: (i, 0)),      # dfall
            pl.BlockSpec((TB, 1),       lambda i: (i, 0)),      # ix
            pl.BlockSpec((NC, VC),      lambda i: (0, 0)),      # chunked emb projection
            pl.BlockSpec(memory_space=pltpu.MemorySpace.SMEM),  # bias scalar
        ],
        out_specs=pl.BlockSpec((TB, beam), lambda i: (i, 0)),
        compiler_params=pltpu.CompilerParams(
            dimension_semantics=("parallel",),
            vmem_limit_bytes=32 * 1024 * 1024),
    )(capt, lens, idall2, dfall2, ix2, proj, bias)

    return out[:B]                                               # (B, beam)


def _reference(captions, caption_lengths, idall, dfall, ix, emb_table, out_w, out_b):
    """Pure-JAX replica of the torch forward, for verification."""
    pos = jnp.cumsum(jnp.ones_like(captions), axis=2)
    mask = caption_lengths > pos
    tok = mask.astype(captions.dtype) * captions
    ce = emb_table[tok].astype(jnp.float32).sum(axis=2)          # (B, beam, D)
    sc = ce @ out_w.reshape(-1, 1) + out_b.reshape(1, 1)         # (B, beam, 1)
    sc = sc[..., 0]
    idfall = dfall * (idall == ix[:, None]).astype(jnp.float32)
    sc = _const_pow(sc, L_P) * _const_pow(idfall, L_C)
    return jax.nn.log_softmax(sc, axis=1)


if __name__ == "__main__":
    # Small, deterministic problem: batch=2, beam=8, seq=8, vocab=320, dim=32.
    # V=320 with vocab_chunk=128 exercises the chunk loop (3 chunks) and the
    # zero-padded tail chunk.
    B, BEAM, S, V, D = 2, 8, 8, 320, 32
    key = jax.random.PRNGKey(0)
    k1, k2, k3, k4, k5, k6, k7 = jax.random.split(key, 7)

    # Parameters (deterministic init; bert_emb is just a random table here).
    bert_emb = jax.random.normal(k1, (V, D), dtype=jnp.float32)
    out_w = 0.2 * jax.random.normal(k2, (1, D), dtype=jnp.float32)   # Linear(D, 1) weight
    out_b = jnp.array([0.3], dtype=jnp.float32)                      # Linear bias

    # Inputs.
    captions = jax.random.randint(k3, (B, BEAM, S), 0, V, dtype=jnp.int32)
    caption_lengths = jax.random.randint(k4, (B, BEAM, 1), 2, S + 1, dtype=jnp.int32)
    logs = jax.random.normal(k5, (B, BEAM), dtype=jnp.float32)       # unused by forward
    idall = jax.random.randint(k6, (B, BEAM), 0, 4, dtype=jnp.int32)
    dfall = jax.random.uniform(k7, (B, BEAM), dtype=jnp.float32, minval=0.1, maxval=1.0)
    ix = jnp.array([1, 2], dtype=jnp.int32)                          # (B,)

    scores = policy_la_forward(captions, caption_lengths, logs, idall, dfall, ix,
                               bert_emb, out_w, out_b, vocab_chunk=128)
    scores = jax.block_until_ready(scores)

    ref = _reference(captions, caption_lengths, idall, dfall, ix,
                     bert_emb, out_w, out_b)
    np.testing.assert_allclose(np.asarray(scores), np.asarray(ref),
                               rtol=1e-4, atol=1e-4)
    print("KERNEL_OK")
</pallas_src>

<mosaic_0001>
module attributes {stable_mosaic.version = 11 : i64} {
  func.func @policy_la_kernel(%arg0: i32, %arg1: memref<2x8x8xi32, #tpu.memory_space<vmem>>, %arg2: memref<2x8x1xi32, #tpu.memory_space<vmem>>, %arg3: memref<2x8xi32, #tpu.memory_space<vmem>>, %arg4: memref<2x8xf32, #tpu.memory_space<vmem>>, %arg5: memref<2x1xi32, #tpu.memory_space<vmem>>, %arg6: memref<3x128xf32, #tpu.memory_space<vmem>>, %arg7: memref<1xf32, #tpu.memory_space<smem>>, %arg8: memref<2x8xf32, #tpu.memory_space<vmem>>) attributes {dimension_semantics = [#tpu.dimension_semantics<parallel>], iteration_bounds = array<i64: 1>, scalar_prefetch = 0 : i64, scratch_operands = 0 : i64, tpu.core_type = #tpu.core_type<tc>, window_params = [{transform_indices = @transform_0, window_bounds = array<i64: 2, 8, 8>}, {transform_indices = @transform_1, window_bounds = array<i64: 2, 8, 1>}, {transform_indices = @transform_2, window_bounds = array<i64: 2, 8>}, {transform_indices = @transform_3, window_bounds = array<i64: 2, 8>}, {transform_indices = @transform_4, window_bounds = array<i64: 2, 1>}, {pipeline_mode = #tpu.pipeline_mode<synchronous>, transform_indices = @transform_5, window_bounds = array<i64: 3, 128>}, {transform_indices = @transform_6, window_bounds = array<i64: 1>}, {transform_indices = @transform_7, window_bounds = array<i64: 2, 8>}]} {
    %c0 = arith.constant 0 : index
    %c0_0 = arith.constant 0 : index
    %c0_1 = arith.constant 0 : index
    %0 = vector.load %arg1[%c0, %c0_0, %c0_1] : memref<2x8x8xi32, #tpu.memory_space<vmem>>, vector<2x8x8xi32>
    %c0_2 = arith.constant 0 : index
    %c0_3 = arith.constant 0 : index
    %c0_4 = arith.constant 0 : index
    %1 = vector.load %arg2[%c0_2, %c0_3, %c0_4] : memref<2x8x1xi32, #tpu.memory_space<vmem>>, vector<2x8x1xi32>
    %2 = tpu.iota {dimensions = array<i32: 2>} : vector<2x8x8xi32>
    %c1_i32 = arith.constant 1 : i32
    %3 = vector.broadcast %c1_i32 : i32 to vector<2x8x8xi32>
    %4 = arith.addi %2, %3 : vector<2x8x8xi32>
    %5 = vector.broadcast %1 : vector<2x8x1xi32> to vector<2x8x8xi32>
    %6 = arith.cmpi sgt, %5, %4 : vector<2x8x8xi32>
    %c0_i32 = arith.constant 0 : i32
    %7 = vector.broadcast %c0_i32 : i32 to vector<2x8x8xi32>
    %8 = arith.select %6, %0, %7 : vector<2x8x8xi1>, vector<2x8x8xi32>
    %9 = tpu.iota {dimensions = array<i32: 2>} : vector<1x1x128xi32>
    %cst = arith.constant 0.000000e+00 : f32
    %10 = vector.broadcast %cst : f32 to vector<2x8xf32>
    %c0_5 = arith.constant 0 : index
    %c0_6 = arith.constant 0 : index
    %11 = vector.load %arg6[%c0_5, %c0_6] : memref<3x128xf32, #tpu.memory_space<vmem>>, vector<1x128xf32>
    %12 = vector.shape_cast %11 : vector<1x128xf32> to vector<1x1x128xf32>
    %c0_i32_7 = arith.constant 0 : i32
    %13 = vector.broadcast %c0_i32_7 : i32 to vector<2x8x8xi32>
    %14 = arith.subi %8, %13 : vector<2x8x8xi32>
    %cst_8 = arith.constant 0.000000e+00 : f32
    %15 = vector.broadcast %cst_8 : f32 to vector<2x8xf32>
    %16 = vector.extract_strided_slice %14 {offsets = [0, 0, 0], sizes = [2, 8, 1], strides = [1, 1, 1]} : vector<2x8x8xi32> to vector<2x8x1xi32>
    %17 = vector.broadcast %16 : vector<2x8x1xi32> to vector<2x8x128xi32>
    %18 = vector.broadcast %9 : vector<1x1x128xi32> to vector<2x8x128xi32>
    %19 = arith.cmpi eq, %17, %18 : vector<2x8x128xi32>
    %20 = arith.extui %19 : vector<2x8x128xi1> to vector<2x8x128xi32>
    %21 = arith.sitofp %20 : vector<2x8x128xi32> to vector<2x8x128xf32>
    %22 = vector.broadcast %12 : vector<1x1x128xf32> to vector<2x8x128xf32>
    %23 = arith.mulf %21, %22 : vector<2x8x128xf32>
    %cst_9 = arith.constant dense<0.000000e+00> : vector<2x8xf32>
    %24 = vector.multi_reduction <add>, %23, %cst_9 [2] : vector<2x8x128xf32> to vector<2x8xf32>
    %25 = arith.addf %15, %24 : vector<2x8xf32>
    %26 = vector.extract_strided_slice %14 {offsets = [0, 0, 1], sizes = [2, 8, 1], strides = [1, 1, 1]} : vector<2x8x8xi32> to vector<2x8x1xi32>
    %27 = vector.broadcast %26 : vector<2x8x1xi32> to vector<2x8x128xi32>
    %28 = vector.broadcast %9 : vector<1x1x128xi32> to vector<2x8x128xi32>
    %29 = arith.cmpi eq, %27, %28 : vector<2x8x128xi32>
    %30 = arith.extui %29 : vector<2x8x128xi1> to vector<2x8x128xi32>
    %31 = arith.sitofp %30 : vector<2x8x128xi32> to vector<2x8x128xf32>
    %32 = vector.broadcast %12 : vector<1x1x128xf32> to vector<2x8x128xf32>
    %33 = arith.mulf %31, %32 : vector<2x8x128xf32>
    %cst_10 = arith.constant dense<0.000000e+00> : vector<2x8xf32>
    %34 = vector.multi_reduction <add>, %33, %cst_10 [2] : vector<2x8x128xf32> to vector<2x8xf32>
    %35 = arith.addf %25, %34 : vector<2x8xf32>
    %36 = vector.extract_strided_slice %14 {offsets = [0, 0, 2], sizes = [2, 8, 1], strides = [1, 1, 1]} : vector<2x8x8xi32> to vector<2x8x1xi32>
    %37 = vector.broadcast %36 : vector<2x8x1xi32> to vector<2x8x128xi32>
    %38 = vector.broadcast %9 : vector<1x1x128xi32> to vector<2x8x128xi32>
    %39 = arith.cmpi eq, %37, %38 : vector<2x8x128xi32>
    %40 = arith.extui %39 : vector<2x8x128xi1> to vector<2x8x128xi32>
    %41 = arith.sitofp %40 : vector<2x8x128xi32> to vector<2x8x128xf32>
    %42 = vector.broadcast %12 : vector<1x1x128xf32> to vector<2x8x128xf32>
    %43 = arith.mulf %41, %42 : vector<2x8x128xf32>
    %cst_11 = arith.constant dense<0.000000e+00> : vector<2x8xf32>
    %44 = vector.multi_reduction <add>, %43, %cst_11 [2] : vector<2x8x128xf32> to vector<2x8xf32>
    %45 = arith.addf %35, %44 : vector<2x8xf32>
    %46 = vector.extract_strided_slice %14 {offsets = [0, 0, 3], sizes = [2, 8, 1], strides = [1, 1, 1]} : vector<2x8x8xi32> to vector<2x8x1xi32>
    %47 = vector.broadcast %46 : vector<2x8x1xi32> to vector<2x8x128xi32>
    %48 = vector.broadcast %9 : vector<1x1x128xi32> to vector<2x8x128xi32>
    %49 = arith.cmpi eq, %47, %48 : vector<2x8x128xi32>
    %50 = arith.extui %49 : vector<2x8x128xi1> to vector<2x8x128xi32>
    %51 = arith.sitofp %50 : vector<2x8x128xi32> to vector<2x8x128xf32>
    %52 = vector.broadcast %12 : vector<1x1x128xf32> to vector<2x8x128xf32>
    %53 = arith.mulf %51, %52 : vector<2x8x128xf32>
    %cst_12 = arith.constant dense<0.000000e+00> : vector<2x8xf32>
    %54 = vector.multi_reduction <add>, %53, %cst_12 [2] : vector<2x8x128xf32> to vector<2x8xf32>
    %55 = arith.addf %45, %54 : vector<2x8xf32>
    %56 = vector.extract_strided_slice %14 {offsets = [0, 0, 4], sizes = [2, 8, 1], strides = [1, 1, 1]} : vector<2x8x8xi32> to vector<2x8x1xi32>
    %57 = vector.broadcast %56 : vector<2x8x1xi32> to vector<2x8x128xi32>
    %58 = vector.broadcast %9 : vector<1x1x128xi32> to vector<2x8x128xi32>
    %59 = arith.cmpi eq, %57, %58 : vector<2x8x128xi32>
    %60 = arith.extui %59 : vector<2x8x128xi1> to vector<2x8x128xi32>
    %61 = arith.sitofp %60 : vector<2x8x128xi32> to vector<2x8x128xf32>
    %62 = vector.broadcast %12 : vector<1x1x128xf32> to vector<2x8x128xf32>
    %63 = arith.mulf %61, %62 : vector<2x8x128xf32>
    %cst_13 = arith.constant dense<0.000000e+00> : vector<2x8xf32>
    %64 = vector.multi_reduction <add>, %63, %cst_13 [2] : vector<2x8x128xf32> to vector<2x8xf32>
    %65 = arith.addf %55, %64 : vector<2x8xf32>
    %66 = vector.extract_strided_slice %14 {offsets = [0, 0, 5], sizes = [2, 8, 1], strides = [1, 1, 1]} : vector<2x8x8xi32> to vector<2x8x1xi32>
    %67 = vector.broadcast %66 : vector<2x8x1xi32> to vector<2x8x128xi32>
    %68 = vector.broadcast %9 : vector<1x1x128xi32> to vector<2x8x128xi32>
    %69 = arith.cmpi eq, %67, %68 : vector<2x8x128xi32>
    %70 = arith.extui %69 : vector<2x8x128xi1> to vector<2x8x128xi32>
    %71 = arith.sitofp %70 : vector<2x8x128xi32> to vector<2x8x128xf32>
    %72 = vector.broadcast %12 : vector<1x1x128xf32> to vector<2x8x128xf32>
    %73 = arith.mulf %71, %72 : vector<2x8x128xf32>
    %cst_14 = arith.constant dense<0.000000e+00> : vector<2x8xf32>
    %74 = vector.multi_reduction <add>, %73, %cst_14 [2] : vector<2x8x128xf32> to vector<2x8xf32>
    %75 = arith.addf %65, %74 : vector<2x8xf32>
    %76 = vector.extract_strided_slice %14 {offsets = [0, 0, 6], sizes = [2, 8, 1], strides = [1, 1, 1]} : vector<2x8x8xi32> to vector<2x8x1xi32>
    %77 = vector.broadcast %76 : vector<2x8x1xi32> to vector<2x8x128xi32>
    %78 = vector.broadcast %9 : vector<1x1x128xi32> to vector<2x8x128xi32>
    %79 = arith.cmpi eq, %77, %78 : vector<2x8x128xi32>
    %80 = arith.extui %79 : vector<2x8x128xi1> to vector<2x8x128xi32>
    %81 = arith.sitofp %80 : vector<2x8x128xi32> to vector<2x8x128xf32>
    %82 = vector.broadcast %12 : vector<1x1x128xf32> to vector<2x8x128xf32>
    %83 = arith.mulf %81, %82 : vector<2x8x128xf32>
    %cst_15 = arith.constant dense<0.000000e+00> : vector<2x8xf32>
    %84 = vector.multi_reduction <add>, %83, %cst_15 [2] : vector<2x8x128xf32> to vector<2x8xf32>
    %85 = arith.addf %75, %84 : vector<2x8xf32>
    %86 = vector.extract_strided_slice %14 {offsets = [0, 0, 7], sizes = [2, 8, 1], strides = [1, 1, 1]} : vector<2x8x8xi32> to vector<2x8x1xi32>
    %87 = vector.broadcast %86 : vector<2x8x1xi32> to vector<2x8x128xi32>
    %88 = vector.broadcast %9 : vector<1x1x128xi32> to vector<2x8x128xi32>
    %89 = arith.cmpi eq, %87, %88 : vector<2x8x128xi32>
    %90 = arith.extui %89 : vector<2x8x128xi1> to vector<2x8x128xi32>
    %91 = arith.sitofp %90 : vector<2x8x128xi32> to vector<2x8x128xf32>
    %92 = vector.broadcast %12 : vector<1x1x128xf32> to vector<2x8x128xf32>
    %93 = arith.mulf %91, %92 : vector<2x8x128xf32>
    %cst_16 = arith.constant dense<0.000000e+00> : vector<2x8xf32>
    %94 = vector.multi_reduction <add>, %93, %cst_16 [2] : vector<2x8x128xf32> to vector<2x8xf32>
    %95 = arith.addf %85, %94 : vector<2x8xf32>
    %96 = arith.addf %10, %95 : vector<2x8xf32>
    %c1 = arith.constant 1 : index
    %c0_17 = arith.constant 0 : index
    %97 = vector.load %arg6[%c1, %c0_17] : memref<3x128xf32, #tpu.memory_space<vmem>>, vector<1x128xf32>
    %98 = vector.shape_cast %97 : vector<1x128xf32> to vector<1x1x128xf32>
    %c128_i32 = arith.constant 128 : i32
    %99 = vector.broadcast %c128_i32 : i32 to vector<2x8x8xi32>
    %100 = arith.subi %8, %99 : vector<2x8x8xi32>
    %cst_18 = arith.constant 0.000000e+00 : f32
    %101 = vector.broadcast %cst_18 : f32 to vector<2x8xf32>
    %102 = vector.extract_strided_slice %100 {offsets = [0, 0, 0], sizes = [2, 8, 1], strides = [1, 1, 1]} : vector<2x8x8xi32> to vector<2x8x1xi32>
    %103 = vector.broadcast %102 : vector<2x8x1xi32> to vector<2x8x128xi32>
    %104 = vector.broadcast %9 : vector<1x1x128xi32> to vector<2x8x128xi32>
    %105 = arith.cmpi eq, %103, %104 : vector<2x8x128xi32>
    %106 = arith.extui %105 : vector<2x8x128xi1> to vector<2x8x128xi32>
    %107 = arith.sitofp %106 : vector<2x8x128xi32> to vector<2x8x128xf32>
    %108 = vector.broadcast %98 : vector<1x1x128xf32> to vector<2x8x128xf32>
    %109 = arith.mulf %107, %108 : vector<2x8x128xf32>
    %cst_19 = arith.constant dense<0.000000e+00> : vector<2x8xf32>
    %110 = vector.multi_reduction <add>, %109, %cst_19 [2] : vector<2x8x128xf32> to vector<2x8xf32>
    %111 = arith.addf %101, %110 : vector<2x8xf32>
    %112 = vector.extract_strided_slice %100 {offsets = [0, 0, 1], sizes = [2, 8, 1], strides = [1, 1, 1]} : vector<2x8x8xi32> to vector<2x8x1xi32>
    %113 = vector.broadcast %112 : vector<2x8x1xi32> to vector<2x8x128xi32>
    %114 = vector.broadcast %9 : vector<1x1x128xi32> to vector<2x8x128xi32>
    %115 = arith.cmpi eq, %113, %114 : vector<2x8x128xi32>
    %116 = arith.extui %115 : vector<2x8x128xi1> to vector<2x8x128xi32>
    %117 = arith.sitofp %116 : vector<2x8x128xi32> to vector<2x8x128xf32>
    %118 = vector.broadcast %98 : vector<1x1x128xf32> to vector<2x8x128xf32>
    %119 = arith.mulf %117, %118 : vector<2x8x128xf32>
    %cst_20 = arith.constant dense<0.000000e+00> : vector<2x8xf32>
    %120 = vector.multi_reduction <add>, %119, %cst_20 [2] : vector<2x8x128xf32> to vector<2x8xf32>
    %121 = arith.addf %111, %120 : vector<2x8xf32>
    %122 = vector.extract_strided_slice %100 {offsets = [0, 0, 2], sizes = [2, 8, 1], strides = [1, 1, 1]} : vector<2x8x8xi32> to vector<2x8x1xi32>
    %123 = vector.broadcast %122 : vector<2x8x1xi32> to vector<2x8x128xi32>
    %124 = vector.broadcast %9 : vector<1x1x128xi32> to vector<2x8x128xi32>
    %125 = arith.cmpi eq, %123, %124 : vector<2x8x128xi32>
    %126 = arith.extui %125 : vector<2x8x128xi1> to vector<2x8x128xi32>
    %127 = arith.sitofp %126 : vector<2x8x128xi32> to vector<2x8x128xf32>
    %128 = vector.broadcast %98 : vector<1x1x128xf32> to vector<2x8x128xf32>
    %129 = arith.mulf %127, %128 : vector<2x8x128xf32>
    %cst_21 = arith.constant dense<0.000000e+00> : vector<2x8xf32>
    %130 = vector.multi_reduction <add>, %129, %cst_21 [2] : vector<2x8x128xf32> to vector<2x8xf32>
    %131 = arith.addf %121, %130 : vector<2x8xf32>
    %132 = vector.extract_strided_slice %100 {offsets = [0, 0, 3], sizes = [2, 8, 1], strides = [1, 1, 1]} : vector<2x8x8xi32> to vector<2x8x1xi32>
    %133 = vector.broadcast %132 : vector<2x8x1xi32> to vector<2x8x128xi32>
    %134 = vector.broadcast %9 : vector<1x1x128xi32> to vector<2x8x128xi32>
    %135 = arith.cmpi eq, %133, %134 : vector<2x8x128xi32>
    %136 = arith.extui %135 : vector<2x8x128xi1> to vector<2x8x128xi32>
    %137 = arith.sitofp %136 : vector<2x8x128xi32> to vector<2x8x128xf32>
    %138 = vector.broadcast %98 : vector<1x1x128xf32> to vector<2x8x128xf32>
    %139 = arith.mulf %137, %138 : vector<2x8x128xf32>
    %cst_22 = arith.constant dense<0.000000e+00> : vector<2x8xf32>
    %140 = vector.multi_reduction <add>, %139, %cst_22 [2] : vector<2x8x128xf32> to vector<2x8xf32>
    %141 = arith.addf %131, %140 : vector<2x8xf32>
    %142 = vector.extract_strided_slice %100 {offsets = [0, 0, 4], sizes = [2, 8, 1], strides = [1, 1, 1]} : vector<2x8x8xi32> to vector<2x8x1xi32>
    %143 = vector.broadcast %142 : vector<2x8x1xi32> to vector<2x8x128xi32>
    %144 = vector.broadcast %9 : vector<1x1x128xi32> to vector<2x8x128xi32>
    %145 = arith.cmpi eq, %143, %144 : vector<2x8x128xi32>
    %146 = arith.extui %145 : vector<2x8x128xi1> to vector<2x8x128xi32>
    %147 = arith.sitofp %146 : vector<2x8x128xi32> to vector<2x8x128xf32>
    %148 = vector.broadcast %98 : vector<1x1x128xf32> to vector<2x8x128xf32>
    %149 = arith.mulf %147, %148 : vector<2x8x128xf32>
    %cst_23 = arith.constant dense<0.000000e+00> : vector<2x8xf32>
    %150 = vector.multi_reduction <add>, %149, %cst_23 [2] : vector<2x8x128xf32> to vector<2x8xf32>
    %151 = arith.addf %141, %150 : vector<2x8xf32>
    %152 = vector.extract_strided_slice %100 {offsets = [0, 0, 5], sizes = [2, 8, 1], strides = [1, 1, 1]} : vector<2x8x8xi32> to vector<2x8x1xi32>
    %153 = vector.broadcast %152 : vector<2x8x1xi32> to vector<2x8x128xi32>
    %154 = vector.broadcast %9 : vector<1x1x128xi32> to vector<2x8x128xi32>
    %155 = arith.cmpi eq, %153, %154 : vector<2x8x128xi32>
    %156 = arith.extui %155 : vector<2x8x128xi1> to vector<2x8x128xi32>
    %157 = arith.sitofp %156 : vector<2x8x128xi32> to vector<2x8x128xf32>
    %158 = vector.broadcast %98 : vector<1x1x128xf32> to vector<2x8x128xf32>
    %159 = arith.mulf %157, %158 : vector<2x8x128xf32>
    %cst_24 = arith.constant dense<0.000000e+00> : vector<2x8xf32>
    %160 = vector.multi_reduction <add>, %159, %cst_24 [2] : vector<2x8x128xf32> to vector<2x8xf32>
    %161 = arith.addf %151, %160 : vector<2x8xf32>
    %162 = vector.extract_strided_slice %100 {offsets = [0, 0, 6], sizes = [2, 8, 1], strides = [1, 1, 1]} : vector<2x8x8xi32> to vector<2x8x1xi32>
    %163 = vector.broadcast %162 : vector<2x8x1xi32> to vector<2x8x128xi32>
    %164 = vector.broadcast %9 : vector<1x1x128xi32> to vector<2x8x128xi32>
    %165 = arith.cmpi eq, %163, %164 : vector<2x8x128xi32>
    %166 = arith.extui %165 : vector<2x8x128xi1> to vector<2x8x128xi32>
    %167 = arith.sitofp %166 : vector<2x8x128xi32> to vector<2x8x128xf32>
    %168 = vector.broadcast %98 : vector<1x1x128xf32> to vector<2x8x128xf32>
    %169 = arith.mulf %167, %168 : vector<2x8x128xf32>
    %cst_25 = arith.constant dense<0.000000e+00> : vector<2x8xf32>
    %170 = vector.multi_reduction <add>, %169, %cst_25 [2] : vector<2x8x128xf32> to vector<2x8xf32>
    %171 = arith.addf %161, %170 : vector<2x8xf32>
    %172 = vector.extract_strided_slice %100 {offsets = [0, 0, 7], sizes = [2, 8, 1], strides = [1, 1, 1]} : vector<2x8x8xi32> to vector<2x8x1xi32>
    %173 = vector.broadcast %172 : vector<2x8x1xi32> to vector<2x8x128xi32>
    %174 = vector.broadcast %9 : vector<1x1x128xi32> to vector<2x8x128xi32>
    %175 = arith.cmpi eq, %173, %174 : vector<2x8x128xi32>
    %176 = arith.extui %175 : vector<2x8x128xi1> to vector<2x8x128xi32>
    %177 = arith.sitofp %176 : vector<2x8x128xi32> to vector<2x8x128xf32>
    %178 = vector.broadcast %98 : vector<1x1x128xf32> to vector<2x8x128xf32>
    %179 = arith.mulf %177, %178 : vector<2x8x128xf32>
    %cst_26 = arith.constant dense<0.000000e+00> : vector<2x8xf32>
    %180 = vector.multi_reduction <add>, %179, %cst_26 [2] : vector<2x8x128xf32> to vector<2x8xf32>
    %181 = arith.addf %171, %180 : vector<2x8xf32>
    %182 = arith.addf %96, %181 : vector<2x8xf32>
    %c2 = arith.constant 2 : index
    %c0_27 = arith.constant 0 : index
    %183 = vector.load %arg6[%c2, %c0_27] : memref<3x128xf32, #tpu.memory_space<vmem>>, vector<1x128xf32>
    %184 = vector.shape_cast %183 : vector<1x128xf32> to vector<1x1x128xf32>
    %c256_i32 = arith.constant 256 : i32
    %185 = vector.broadcast %c256_i32 : i32 to vector<2x8x8xi32>
    %186 = arith.subi %8, %185 : vector<2x8x8xi32>
    %cst_28 = arith.constant 0.000000e+00 : f32
    %187 = vector.broadcast %cst_28 : f32 to vector<2x8xf32>
    %188 = vector.extract_strided_slice %186 {offsets = [0, 0, 0], sizes = [2, 8, 1], strides = [1, 1, 1]} : vector<2x8x8xi32> to vector<2x8x1xi32>
    %189 = vector.broadcast %188 : vector<2x8x1xi32> to vector<2x8x128xi32>
    %190 = vector.broadcast %9 : vector<1x1x128xi32> to vector<2x8x128xi32>
    %191 = arith.cmpi eq, %189, %190 : vector<2x8x128xi32>
    %192 = arith.extui %191 : vector<2x8x128xi1> to vector<2x8x128xi32>
    %193 = arith.sitofp %192 : vector<2x8x128xi32> to vector<2x8x128xf32>
    %194 = vector.broadcast %184 : vector<1x1x128xf32> to vector<2x8x128xf32>
    %195 = arith.mulf %193, %194 : vector<2x8x128xf32>
    %cst_29 = arith.constant dense<0.000000e+00> : vector<2x8xf32>
    %196 = vector.multi_reduction <add>, %195, %cst_29 [2] : vector<2x8x128xf32> to vector<2x8xf32>
    %197 = arith.addf %187, %196 : vector<2x8xf32>
    %198 = vector.extract_strided_slice %186 {offsets = [0, 0, 1], sizes = [2, 8, 1], strides = [1, 1, 1]} : vector<2x8x8xi32> to vector<2x8x1xi32>
    %199 = vector.broadcast %198 : vector<2x8x1xi32> to vector<2x8x128xi32>
    %200 = vector.broadcast %9 : vector<1x1x128xi32> to vector<2x8x128xi32>
    %201 = arith.cmpi eq, %199, %200 : vector<2x8x128xi32>
    %202 = arith.extui %201 : vector<2x8x128xi1> to vector<2x8x128xi32>
    %203 = arith.sitofp %202 : vector<2x8x128xi32> to vector<2x8x128xf32>
    %204 = vector.broadcast %184 : vector<1x1x128xf32> to vector<2x8x128xf32>
    %205 = arith.mulf %203, %204 : vector<2x8x128xf32>
    %cst_30 = arith.constant dense<0.000000e+00> : vector<2x8xf32>
    %206 = vector.multi_reduction <add>, %205, %cst_30 [2] : vector<2x8x128xf32> to vector<2x8xf32>
    %207 = arith.addf %197, %206 : vector<2x8xf32>
    %208 = vector.extract_strided_slice %186 {offsets = [0, 0, 2], sizes = [2, 8, 1], strides = [1, 1, 1]} : vector<2x8x8xi32> to vector<2x8x1xi32>
    %209 = vector.broadcast %208 : vector<2x8x1xi32> to vector<2x8x128xi32>
    %210 = vector.broadcast %9 : vector<1x1x128xi32> to vector<2x8x128xi32>
    %211 = arith.cmpi eq, %209, %210 : vector<2x8x128xi32>
    %212 = arith.extui %211 : vector<2x8x128xi1> to vector<2x8x128xi32>
    %213 = arith.sitofp %212 : vector<2x8x128xi32> to vector<2x8x128xf32>
    %214 = vector.broadcast %184 : vector<1x1x128xf32> to vector<2x8x128xf32>
    %215 = arith.mulf %213, %214 : vector<2x8x128xf32>
    %cst_31 = arith.constant dense<0.000000e+00> : vector<2x8xf32>
    %216 = vector.multi_reduction <add>, %215, %cst_31 [2] : vector<2x8x128xf32> to vector<2x8xf32>
    %217 = arith.addf %207, %216 : vector<2x8xf32>
    %218 = vector.extract_strided_slice %186 {offsets = [0, 0, 3], sizes = [2, 8, 1], strides = [1, 1, 1]} : vector<2x8x8xi32> to vector<2x8x1xi32>
    %219 = vector.broadcast %218 : vector<2x8x1xi32> to vector<2x8x128xi32>
    %220 = vector.broadcast %9 : vector<1x1x128xi32> to vector<2x8x128xi32>
    %221 = arith.cmpi eq, %219, %220 : vector<2x8x128xi32>
    %222 = arith.extui %221 : vector<2x8x128xi1> to vector<2x8x128xi32>
    %223 = arith.sitofp %222 : vector<2x8x128xi32> to vector<2x8x128xf32>
    %224 = vector.broadcast %184 : vector<1x1x128xf32> to vector<2x8x128xf32>
    %225 = arith.mulf %223, %224 : vector<2x8x128xf32>
    %cst_32 = arith.constant dense<0.000000e+00> : vector<2x8xf32>
    %226 = vector.multi_reduction <add>, %225, %cst_32 [2] : vector<2x8x128xf32> to vector<2x8xf32>
    %227 = arith.addf %217, %226 : vector<2x8xf32>
    %228 = vector.extract_strided_slice %186 {offsets = [0, 0, 4], sizes = [2, 8, 1], strides = [1, 1, 1]} : vector<2x8x8xi32> to vector<2x8x1xi32>
    %229 = vector.broadcast %228 : vector<2x8x1xi32> to vector<2x8x128xi32>
    %230 = vector.broadcast %9 : vector<1x1x128xi32> to vector<2x8x128xi32>
    %231 = arith.cmpi eq, %229, %230 : vector<2x8x128xi32>
    %232 = arith.extui %231 : vector<2x8x128xi1> to vector<2x8x128xi32>
    %233 = arith.sitofp %232 : vector<2x8x128xi32> to vector<2x8x128xf32>
    %234 = vector.broadcast %184 : vector<1x1x128xf32> to vector<2x8x128xf32>
    %235 = arith.mulf %233, %234 : vector<2x8x128xf32>
    %cst_33 = arith.constant dense<0.000000e+00> : vector<2x8xf32>
    %236 = vector.multi_reduction <add>, %235, %cst_33 [2] : vector<2x8x128xf32> to vector<2x8xf32>
    %237 = arith.addf %227, %236 : vector<2x8xf32>
    %238 = vector.extract_strided_slice %186 {offsets = [0, 0, 5], sizes = [2, 8, 1], strides = [1, 1, 1]} : vector<2x8x8xi32> to vector<2x8x1xi32>
    %239 = vector.broadcast %238 : vector<2x8x1xi32> to vector<2x8x128xi32>
    %240 = vector.broadcast %9 : vector<1x1x128xi32> to vector<2x8x128xi32>
    %241 = arith.cmpi eq, %239, %240 : vector<2x8x128xi32>
    %242 = arith.extui %241 : vector<2x8x128xi1> to vector<2x8x128xi32>
    %243 = arith.sitofp %242 : vector<2x8x128xi32> to vector<2x8x128xf32>
    %244 = vector.broadcast %184 : vector<1x1x128xf32> to vector<2x8x128xf32>
    %245 = arith.mulf %243, %244 : vector<2x8x128xf32>
    %cst_34 = arith.constant dense<0.000000e+00> : vector<2x8xf32>
    %246 = vector.multi_reduction <add>, %245, %cst_34 [2] : vector<2x8x128xf32> to vector<2x8xf32>
    %247 = arith.addf %237, %246 : vector<2x8xf32>
    %248 = vector.extract_strided_slice %186 {offsets = [0, 0, 6], sizes = [2, 8, 1], strides = [1, 1, 1]} : vector<2x8x8xi32> to vector<2x8x1xi32>
    %249 = vector.broadcast %248 : vector<2x8x1xi32> to vector<2x8x128xi32>
    %250 = vector.broadcast %9 : vector<1x1x128xi32> to vector<2x8x128xi32>
    %251 = arith.cmpi eq, %249, %250 : vector<2x8x128xi32>
    %252 = arith.extui %251 : vector<2x8x128xi1> to vector<2x8x128xi32>
    %253 = arith.sitofp %252 : vector<2x8x128xi32> to vector<2x8x128xf32>
    %254 = vector.broadcast %184 : vector<1x1x128xf32> to vector<2x8x128xf32>
    %255 = arith.mulf %253, %254 : vector<2x8x128xf32>
    %cst_35 = arith.constant dense<0.000000e+00> : vector<2x8xf32>
    %256 = vector.multi_reduction <add>, %255, %cst_35 [2] : vector<2x8x128xf32> to vector<2x8xf32>
    %257 = arith.addf %247, %256 : vector<2x8xf32>
    %258 = vector.extract_strided_slice %186 {offsets = [0, 0, 7], sizes = [2, 8, 1], strides = [1, 1, 1]} : vector<2x8x8xi32> to vector<2x8x1xi32>
    %259 = vector.broadcast %258 : vector<2x8x1xi32> to vector<2x8x128xi32>
    %260 = vector.broadcast %9 : vector<1x1x128xi32> to vector<2x8x128xi32>
    %261 = arith.cmpi eq, %259, %260 : vector<2x8x128xi32>
    %262 = arith.extui %261 : vector<2x8x128xi1> to vector<2x8x128xi32>
    %263 = arith.sitofp %262 : vector<2x8x128xi32> to vector<2x8x128xf32>
    %264 = vector.broadcast %184 : vector<1x1x128xf32> to vector<2x8x128xf32>
    %265 = arith.mulf %263, %264 : vector<2x8x128xf32>
    %cst_36 = arith.constant dense<0.000000e+00> : vector<2x8xf32>
    %266 = vector.multi_reduction <add>, %265, %cst_36 [2] : vector<2x8x128xf32> to vector<2x8xf32>
    %267 = arith.addf %257, %266 : vector<2x8xf32>
    %268 = arith.addf %182, %267 : vector<2x8xf32>
    %c0_37 = arith.constant 0 : index
    %269 = memref.load %arg7[%c0_37] : memref<1xf32, #tpu.memory_space<smem>>
    %270 = vector.broadcast %269 : f32 to vector<2x8xf32>
    %271 = arith.addf %268, %270 : vector<2x8xf32>
    %c0_38 = arith.constant 0 : index
    %c0_39 = arith.constant 0 : index
    %272 = vector.load %arg4[%c0_38, %c0_39] : memref<2x8xf32, #tpu.memory_space<vmem>>, vector<2x8xf32>
    %c0_40 = arith.constant 0 : index
    %c0_41 = arith.constant 0 : index
    %273 = vector.load %arg3[%c0_40, %c0_41] : memref<2x8xi32, #tpu.memory_space<vmem>>, vector<2x8xi32>
    %c0_42 = arith.constant 0 : index
    %c0_43 = arith.constant 0 : index
    %274 = vector.load %arg5[%c0_42, %c0_43] : memref<2x1xi32, #tpu.memory_space<vmem>>, vector<2x1xi32>
    %275 = vector.broadcast %274 : vector<2x1xi32> to vector<2x8xi32>
    %276 = arith.cmpi eq, %273, %275 : vector<2x8xi32>
    %277 = arith.extui %276 : vector<2x8xi1> to vector<2x8xi32>
    %278 = arith.sitofp %277 : vector<2x8xi32> to vector<2x8xf32>
    %279 = arith.mulf %272, %278 : vector<2x8xf32>
    %280 = arith.mulf %271, %279 : vector<2x8xf32>
    %cst_44 = arith.constant dense<0xFF800000> : vector<2xf32>
    %281 = vector.multi_reduction <maximumf>, %280, %cst_44 [1] : vector<2x8xf32> to vector<2xf32>
    %282 = vector.shape_cast %281 : vector<2xf32> to vector<2x1xf32>
    %283 = vector.broadcast %282 : vector<2x1xf32> to vector<2x8xf32>
    %284 = arith.subf %280, %283 : vector<2x8xf32>
    %285 = math.exp %284 : vector<2x8xf32>
    %cst_45 = arith.constant dense<0.000000e+00> : vector<2xf32>
    %286 = vector.multi_reduction <add>, %285, %cst_45 [1] : vector<2x8xf32> to vector<2xf32>
    %287 = vector.shape_cast %286 : vector<2xf32> to vector<2x1xf32>
    %288 = math.log %287 : vector<2x1xf32>
    %289 = vector.broadcast %288 : vector<2x1xf32> to vector<2x8xf32>
    %290 = arith.subf %284, %289 : vector<2x8xf32>
    %c0_46 = arith.constant 0 : index
    %c0_47 = arith.constant 0 : index
    %291 = vector.load %arg8[%c0_46, %c0_47] : memref<2x8xf32, #tpu.memory_space<vmem>>, vector<2x8xf32>
    tpu.vector_store %arg8[%c0_46, %c0_47], %290 {strides = array<i32>} : memref<2x8xf32, #tpu.memory_space<vmem>>, vector<2x8xf32>,
    return
  }
  func.func @transform_0(%arg0: i32) -> (i32, i32, i32) {
    %c0_i32 = arith.constant 0 : i32
    %c0_i32_0 = arith.constant 0 : i32
    %c0_i32_1 = arith.constant 0 : i32
    return %arg0, %c0_i32, %c0_i32_0 : i32, i32, i32
  }
  func.func @transform_1(%arg0: i32) -> (i32, i32, i32) {
    %c0_i32 = arith.constant 0 : i32
    %c0_i32_0 = arith.constant 0 : i32
    %c0_i32_1 = arith.constant 0 : i32
    return %arg0, %c0_i32, %c0_i32_0 : i32, i32, i32
  }
  func.func @transform_2(%arg0: i32) -> (i32, i32) {
    %c0_i32 = arith.constant 0 : i32
    %c0_i32_0 = arith.constant 0 : i32
    return %arg0, %c0_i32 : i32, i32
  }
  func.func @transform_3(%arg0: i32) -> (i32, i32) {
    %c0_i32 = arith.constant 0 : i32
    %c0_i32_0 = arith.constant 0 : i32
    return %arg0, %c0_i32 : i32, i32
  }
  func.func @transform_4(%arg0: i32) -> (i32, i32) {
    %c0_i32 = arith.constant 0 : i32
    %c0_i32_0 = arith.constant 0 : i32
    return %arg0, %c0_i32 : i32, i32
  }
  func.func @transform_5(%arg0: i32) -> (i32, i32) {
    %c0_i32 = arith.constant 0 : i32
    %c0_i32_0 = arith.constant 0 : i32
    %c0_i32_1 = arith.constant 0 : i32
    return %c0_i32, %c0_i32_0 : i32, i32
  }
  func.func @transform_6(%arg0: i32) -> i32 {
    %c0_i32 = arith.constant 0 : i32
    %c0_i32_0 = arith.constant 0 : i32
    return %c0_i32 : i32
  }
  func.func @transform_7(%arg0: i32) -> (i32, i32) {
    %c0_i32 = arith.constant 0 : i32
    %c0_i32_0 = arith.constant 0 : i32
    return %arg0, %c0_i32 : i32, i32
  }
}

</mosaic_0001>

<bundles_post_ra>
// kernel: tpu_custom_call.1
= control target key start
LH: loop header
LB: loop body
LE: loop exit
PB: predicated region body
PF: predicated region fallthrough
CT: control target
= control target key end

     0   :  { %v829_v1 = vmov 0   ;;  %s1187_s0 = inlined_call_operand.vmem [shape: s32[2,8,8], index: 0, kind: input, shape index: {}]   ;;  %s1188_s1 = inlined_call_operand.vmem [shape: s32[2,8,1], index: 1, kind: input, shape index: {}]   ;;  %s1189_s2 = inlined_call_operand.vmem [shape: s32[2,8], index: 2, kind: input, shape index: {}]   ;;  %s1190_s3 = inlined_call_operand.vmem [shape: f32[2,8], index: 3, kind: input, shape index: {}]   ;;  %s1191_s4 = inlined_call_operand.vmem [shape: s32[2,1], index: 4, kind: input, shape index: {}]   ;;  %s1192_s5 = inlined_call_operand.vmem [shape: f32[3,128], index: 5, kind: input, shape index: {}]   ;;  %s1193_s6 = inlined_call_operand.<no memory space> [shape: f32[1], index: 6, kind: input, shape index: {}]   ;;  %s1194_s7 = inlined_call_operand.hbm [shape: f32[2,8], index: 7, kind: output, shape index: {}]  }
   0x1   :  { %v30_v0 = vld [vmem:[%s1188_s1] sm:$0xff]  ;;  %758 = vset.pattern.permute.xlu0 %v829_v1  ;;  %759 = vset.pattern.permute.xlu1 %v829_v1 }
   0x2   :  { %13 = vsyncpa [#allocation4], 0  ;;  %36 = vperm.xlu0 %758, %v30_v0   ;;  %v31_v2 = vld [vmem:[%s1188_s1 + $0x8] sm:$0xff]  ;;  %v830_v3 = vmov 1   ;;  %v32_v4 = vlaneseq  ;;  %v28_v7 = vld [vmem:[%s1187_s0] sm:$0xff]  ;;  %v831_v13 = vmov 2  }
   0x3   :  { %v29_v10 = vld [vmem:[%s1187_s0 + $0x8] sm:$0xff]  ;;  %v832_v14 = vmov 3   ;;  %v833_v15 = vmov 4   ;;  %v834_v16 = vmov 5   ;;  %v924_v18 = vld [vmem:[%s1192_s5] ss:$0 sm:$0xff] }
   0x4   :  { %v889_v5 = vand.u32 127, %v32_v4  ;;  %v835_v20 = vmov 0.0   ;;  %v836_v49 = vmov 6   ;;  %v837_v50 = vmov 7  }
   0x6   :  { %39 = vperm.xlu0 %758, %v31_v2   ;;  %v34_v6 = vadd.s32 1, %v889_v5 }
   0xa   :  { %760 = vset.pattern.permute.xlu0 %v830_v3 }
  0x7d   :  { %v37_v8 = vpop.permute.xlu0 %36 }
  0x7e   :  { %vm41_vm0 = vcmp.gt.s32.totalorder %v37_v8, %v34_v6 }
  0x7f   :  { %v895_v9 = vsel %vm41_vm0, %v28_v7, 0 }
  0x80   :  { %71 = vperm.xlu0 %760, %v895_v9   ;;  %47 = vperm.xlu1 %759, %v895_v9  }
  0x81   :  { %v40_v11 = vpop.permute.xlu0 %39 }
  0x82   :  { %vm42_vm1 = vcmp.gt.s32.totalorder %v40_v11, %v34_v6 }
  0x83   :  { %v902_v12 = vsel %vm42_vm1, %v29_v10, 0 }
  0x84   :  { %763 = vset.pattern.permute.xlu0 %v831_v13  ;;  %50 = vperm.xlu1 %759, %v902_v12  }
  0x85   :  { %94 = vperm.xlu0 %763, %v902_v12  }
  0x88   :  { %761 = vset.pattern.permute.xlu1 %v830_v3 }
  0x89   :  { %765 = vset.pattern.permute.xlu0 %v832_v14  ;;  %74 = vperm.xlu1 %761, %v902_v12  }
  0x8a   :  { %114 = vperm.xlu0 %765, %v902_v12  }
  0x8d   :  { %762 = vset.pattern.permute.xlu1 %v831_v13 }
  0x8e   :  { %766 = vset.pattern.permute.xlu0 %v833_v15  ;;  %91 = vperm.xlu1 %762, %v895_v9  }
  0x8f   :  { %131 = vperm.xlu0 %766, %v895_v9  }
  0x92   :  { %764 = vset.pattern.permute.xlu1 %v832_v14 }
  0x93   :  { %111 = vperm.xlu1 %764, %v895_v9   ;;  %769 = vset.pattern.permute.xlu0 %v834_v16 }
  0x97   :  { %767 = vset.pattern.permute.xlu1 %v833_v15 }
  0x98   :  { %134 = vperm.xlu1 %767, %v902_v12  }
  0x9c   :  { %768 = vset.pattern.permute.xlu1 %v834_v16 }
  0xfb   :  { %v48_v17 = vpop.permute.xlu1 %47  ;;  %v72_v19 = vpop.permute.xlu0 %71 }
  0xfc   :  { %vm52_vm2 = vcmp.eq.s32.totalorder %v48_v17, %v889_v5  ;;  %vm76_vm3 = vcmp.eq.s32.totalorder %v72_v19, %v889_v5 }
  0xfd   :  { %v692_v21 = vsel %vm52_vm2, 1.0, %v835_v20  ;;  %v695_v26 = vsel %vm76_vm3, 1.0, %v835_v20 }
  0xfe   :  { %v62_v22 = vmul.f32 %v924_v18, %v692_v21  ;;  %v82_v29 = vmul.f32 %v695_v26, %v924_v18 }
  0xff   :  { %v51_v23 = vpop.permute.xlu1 %50 }
 0x100   :  { %vm53_vm4 = vcmp.eq.s32.totalorder %v51_v23, %v889_v5  ;;  %64 = vadd.xlane.f32.xlu0 %v62_v22  ;;  %v95_v27 = vpop.permute.xlu0 %94 }
 0x101   :  { %v693_v24 = vsel %vm53_vm4, 1.0, %v835_v20  ;;  %vm97_vm6 = vcmp.eq.s32.totalorder %v95_v27, %v889_v5 }
 0x102   :  { %v63_v25 = vmul.f32 %v924_v18, %v693_v24  ;;  %v698_v36 = vsel %vm97_vm6, 1.0, %v835_v20 }
 0x103   :  { %v103_v39 = vmul.f32 %v698_v36, %v924_v18 }
 0x104   :  { %66 = vadd.xlane.f32.xlu1 %v63_v25  ;;  %v75_v28 = vpop.permute.xlu1 %74 }
 0x105   :  { %vm77_vm5 = vcmp.eq.s32.totalorder %v75_v28, %v889_v5  ;;  %v115_v32 = vpop.permute.xlu0 %114 }
 0x106   :  { %v696_v30 = vsel %vm77_vm5, 1.0, %v835_v20  ;;  %vm117_vm8 = vcmp.eq.s32.totalorder %v115_v32, %v889_v5 }
 0x107   :  { %v83_v31 = vmul.f32 %v696_v30, %v924_v18  ;;  %v700_v41 = vsel %vm117_vm8, 1.0, %v835_v20 }
 0x108   :  { %84 = vadd.xlane.f32.xlu1 %v82_v29  ;;  %v123_v44 = vmul.f32 %v700_v41, %v924_v18 }
 0x109   :  { %86 = vadd.xlane.f32.xlu0 %v83_v31  ;;  %v92_v33 = vpop.permute.xlu1 %91 }
 0x10a   :  { %vm96_vm7 = vcmp.eq.s32.totalorder %v92_v33, %v889_v5  ;;  %v132_v38 = vpop.permute.xlu0 %131 }
 0x10b   :  { %v697_v34 = vsel %vm96_vm7, 1.0, %v835_v20  ;;  %vm136_vm10 = vcmp.eq.s32.totalorder %v132_v38, %v889_v5 }
 0x10c   :  { %v102_v35 = vmul.f32 %v697_v34, %v924_v18  ;;  %v701_v45 = vsel %vm136_vm10, 1.0, %v835_v20 }
 0x10d   :  { %v142_v48 = vmul.f32 %v701_v45, %v924_v18 }
 0x10e   :  { %104 = vadd.xlane.f32.xlu1 %v102_v35  ;;  %v112_v37 = vpop.permute.xlu1 %111 }
 0x10f   :  { %vm116_vm9 = vcmp.eq.s32.totalorder %v112_v37, %v889_v5  ;;  %v984_v37 = vadd.s32 4294967168, %v895_v9 }
 0x110   :  { %v699_v40 = vsel %vm116_vm9, 1.0, %v835_v20 }
 0x111   :  { %v122_v42 = vmul.f32 %v699_v40, %v924_v18 }
 0x112   :  { %106 = vadd.xlane.f32.xlu1 %v103_v39 }
 0x113   :  { %124 = vadd.xlane.f32.xlu0 %v122_v42  ;;  %v135_v43 = vpop.permute.xlu1 %134 }
 0x114   :  { %vm137_vm11 = vcmp.eq.s32.totalorder %v135_v43, %v889_v5 }
 0x115   :  { %v702_v46 = vsel %vm137_vm11, 1.0, %v835_v20 }
 0x116   :  { %126 = vadd.xlane.f32.xlu1 %v123_v44  ;;  %v143_v47 = vmul.f32 %v702_v46, %v924_v18  ;;  %v992_v44 = vadd.s32 4294967168, %v902_v12 }
 0x118   :  { %146 = vadd.xlane.f32.xlu0 %v143_v47 }
 0x11a   :  { %144 = vadd.xlane.f32.xlu1 %v142_v48  ;;  %v1001_v48 = vld [vmem:[%s1192_s5 + $0x1] ss:$0 sm:$0xff] }
 0x12b   :  { %151 = vperm.xlu1 %768, %v895_v9  }
 0x12e   :  { %154 = vperm.xlu0 %769, %v902_v12  }
 0x12f   :  { %771 = vset.pattern.permute.xlu1 %v836_v49 }
 0x132   :  { %770 = vset.pattern.permute.xlu0 %v836_v49 }
 0x133   :  { %171 = vperm.xlu0 %770, %v895_v9  }
 0x137   :  { %772 = vset.pattern.permute.xlu0 %v837_v50 }
 0x189   :  { %v65_v53 = vpop.xlane.xlu0 %64 }
 0x18d   :  { %v67_v51 = vpop.xlane.xlu1 %66 }
 0x191   :  { %v85_v52 = vpop.xlane.xlu1 %84 }
 0x192   :  { %v87_v55 = vpop.xlane.xlu0 %86  ;;  %v88_v56 = vadd.f32 %v85_v52, %v65_v53 }
 0x193   :  { %v89_v59 = vadd.f32 %v87_v55, %v67_v51 }
 0x197   :  { %v105_v54 = vpop.xlane.xlu1 %104 }
 0x198   :  { %v108_v57 = vadd.f32 %v105_v54, %v88_v56 }
 0x19b   :  { %v107_v58 = vpop.xlane.xlu1 %106 }
 0x19c   :  { %v125_v60 = vpop.xlane.xlu0 %124  ;;  %v109_v62 = vadd.f32 %v107_v58, %v89_v59 }
 0x19d   :  { %v128_v61 = vadd.f32 %v125_v60, %v108_v57 }
 0x19f   :  { %v127_v63 = vpop.xlane.xlu1 %126 }
 0x1a0   :  { %v129_v0 = vadd.f32 %v127_v63, %v109_v62 }
 0x1a1   :  { %v147_v2 = vpop.xlane.xlu0 %146 }
 0x1a2   :  { %v149_v6 = vadd.f32 %v147_v2, %v129_v0 }
 0x1a3   :  { %v145_v7 = vpop.xlane.xlu1 %144 }
 0x1a4   :  { %v148_v26 = vadd.f32 %v145_v7, %v128_v61 }
 0x1a7   :  { %v152_v8 = vpop.permute.xlu1 %151 }
 0x1a8   :  { %vm156_vm12 = vcmp.eq.s32.totalorder %v152_v8, %v889_v5 }
 0x1a9   :  { %v155_v10 = vpop.permute.xlu0 %154  ;;  %v703_v11 = vsel %vm156_vm12, 1.0, %v835_v20 }
 0x1aa   :  { %vm157_vm13 = vcmp.eq.s32.totalorder %v155_v10, %v889_v5  ;;  %v162_v17 = vmul.f32 %v703_v11, %v924_v18 }
 0x1ab   :  { %v704_v19 = vsel %vm157_vm13, 1.0, %v835_v20 }
 0x1ac   :  { %164 = vadd.xlane.f32.xlu1 %v162_v17  ;;  %v163_v22 = vmul.f32 %v704_v19, %v924_v18 }
 0x1ae   :  { %v172_v21 = vpop.permute.xlu0 %171 }
 0x1af   :  { %vm176_vm14 = vcmp.eq.s32.totalorder %v172_v21, %v889_v5 }
 0x1b0   :  { %v705_v23 = vsel %vm176_vm14, 1.0, %v835_v20  ;;  %166 = vadd.xlane.f32.xlu1 %v163_v22 }
 0x1b1   :  { %v182_v24 = vmul.f32 %v705_v23, %v924_v18 }
 0x1b3   :  { %184 = vadd.xlane.f32.xlu0 %v182_v24 }
 0x1c1   :  { %174 = vperm.xlu1 %771, %v902_v12  }
 0x1c5   :  { %773 = vset.pattern.permute.xlu1 %v837_v50 }
 0x1c9   :  { %191 = vperm.xlu0 %772, %v895_v9  }
 0x1cd   :  { %775 = vset.pattern.permute.xlu0 %v829_v1 }
 0x235   :  { %v165_v25 = vpop.xlane.xlu1 %164 }
 0x236   :  { %v168_v28 = vadd.f32 %v165_v25, %v148_v26 }
 0x239   :  { %v167_v27 = vpop.xlane.xlu1 %166 }
 0x23a   :  { %v169_v38 = vadd.f32 %v167_v27, %v149_v6 }
 0x23c   :  { %v185_v29 = vpop.xlane.xlu0 %184 }
 0x23d   :  { %v188_v30 = vadd.f32 %v185_v29, %v168_v28  ;;  %v175_v31 = vpop.permute.xlu1 %174 }
 0x23e   :  { %vm177_vm15 = vcmp.eq.s32.totalorder %v175_v31, %v889_v5 }
 0x23f   :  { %v706_v32 = vsel %vm177_vm15, 1.0, %v835_v20 }
 0x240   :  { %v183_v33 = vmul.f32 %v706_v32, %v924_v18 }
 0x242   :  { %186 = vadd.xlane.f32.xlu1 %v183_v33 }
 0x244   :  { %v192_v34 = vpop.permute.xlu0 %191 }
 0x245   :  { %vm196_vm0 = vcmp.eq.s32.totalorder %v192_v34, %v889_v5 }
 0x246   :  { %v707_v35 = vsel %vm196_vm0, 1.0, %v835_v20 }
 0x247   :  { %v202_v36 = vmul.f32 %v707_v35, %v924_v18 }
 0x253   :  { %194 = vperm.xlu1 %773, %v902_v12  }
 0x257   :  { %774 = vset.pattern.permute.xlu1 %v829_v1 }
 0x277   :  { %204 = vadd.xlane.f32.xlu1 %v202_v36 }
 0x288   :  { %216 = vperm.xlu1 %774, %v984_v37  }
 0x28c   :  { %776 = vset.pattern.permute.xlu1 %v830_v3 }
 0x2cb   :  { %v187_v39 = vpop.xlane.xlu1 %186 }
 0x2cc   :  { %v189_v40 = vadd.f32 %v187_v39, %v169_v38 }
 0x2cf   :  { %v195_v41 = vpop.permute.xlu1 %194 }
 0x2d0   :  { %vm197_vm1 = vcmp.eq.s32.totalorder %v195_v41, %v889_v5 }
 0x2d1   :  { %v708_v42 = vsel %vm197_vm1, 1.0, %v835_v20 }
 0x2d2   :  { %v203_v43 = vmul.f32 %v708_v42, %v924_v18 }
 0x2d4   :  { %206 = vadd.xlane.f32.xlu0 %v203_v43 }
 0x2ea   :  { %219 = vperm.xlu0 %775, %v992_v44  }
 0x2ee   :  { %777 = vset.pattern.permute.xlu0 %v831_v13 }
 0x300   :  { %v205_v45 = vpop.xlane.xlu1 %204 }
 0x301   :  { %v996_v46 = vadd.f32 %v205_v45, %v188_v30 }
 0x304   :  { %v217_v47 = vpop.permute.xlu1 %216 }
 0x305   :  { %vm221_vm2 = vcmp.eq.s32.totalorder %v217_v47, %v889_v5 }
 0x306   :  { %v711_v18 = vsel %vm221_vm2, 1.0, %v835_v20 }
 0x307   :  { %v231_v51 = vmul.f32 %v1001_v48, %v711_v18 }
 0x309   :  { %233 = vadd.xlane.f32.xlu1 %v231_v51 }
 0x31a   :  { %240 = vperm.xlu1 %776, %v984_v37  }
 0x31e   :  { %243 = vperm.xlu1 %776, %v992_v44  }
 0x322   :  { %778 = vset.pattern.permute.xlu1 %v831_v13 }
 0x35d   :  { %v207_v52 = vpop.xlane.xlu0 %206 }
 0x35e   :  { %v1009_v53 = vadd.f32 %v207_v52, %v189_v40 }
 0x365   :  { %v220_v54 = vpop.permute.xlu0 %219 }
 0x366   :  { %vm222_vm3 = vcmp.eq.s32.totalorder %v220_v54, %v889_v5 }
 0x367   :  { %v712_v55 = vsel %vm222_vm3, 1.0, %v835_v20 }
 0x368   :  { %v232_v56 = vmul.f32 %v1001_v48, %v712_v55 }
 0x36a   :  { %235 = vadd.xlane.f32.xlu0 %v232_v56 }
 0x392   :  { %v234_v57 = vpop.xlane.xlu1 %233 }
 0x396   :  { %v241_v58 = vpop.permute.xlu1 %240 }
 0x397   :  { %vm245_vm4 = vcmp.eq.s32.totalorder %v241_v58, %v889_v5 }
 0x398   :  { %v714_v59 = vsel %vm245_vm4, 1.0, %v835_v20 }
 0x399   :  { %v251_v60 = vmul.f32 %v714_v59, %v1001_v48  ;;  %v728_v59 = vadd.s32 4294967040, %v895_v9 }
 0x39a   :  { %v244_v61 = vpop.permute.xlu1 %243 }
 0x39b   :  { %vm246_vm5 = vcmp.eq.s32.totalorder %v244_v61, %v889_v5  ;;  %253 = vadd.xlane.f32.xlu1 %v251_v60  ;;  %v729_v60 = vadd.s32 4294967040, %v902_v12 }
 0x39c   :  { %v715_v62 = vsel %vm246_vm5, 1.0, %v835_v20 }
 0x39d   :  { %v252_v63 = vmul.f32 %v715_v62, %v1001_v48 }
 0x39f   :  { %255 = vadd.xlane.f32.xlu0 %v252_v63 }
 0x3ac   :  { %263 = vperm.xlu1 %778, %v992_v44  }
 0x3b0   :  { %780 = vset.pattern.permute.xlu1 %v832_v14 }
 0x3b5   :  { %260 = vperm.xlu0 %777, %v984_v37  }
 0x3b9   :  { %779 = vset.pattern.permute.xlu0 %v832_v14 }
 0x3f3   :  { %v236_v0 = vpop.xlane.xlu0 %235 }
 0x424   :  { %v254_v2 = vpop.xlane.xlu1 %253 }
 0x425   :  { %v257_v24 = vadd.f32 %v254_v2, %v234_v57 }
 0x428   :  { %v256_v6 = vpop.xlane.xlu0 %255  ;;  %v264_v7 = vpop.permute.xlu1 %263 }
 0x429   :  { %v258_v8 = vadd.f32 %v256_v6, %v236_v0  ;;  %vm266_vm6 = vcmp.eq.s32.totalorder %v264_v7, %v889_v5 }
 0x42a   :  { %v717_v10 = vsel %vm266_vm6, 1.0, %v835_v20 }
 0x42b   :  { %v272_v11 = vmul.f32 %v717_v10, %v1001_v48 }
 0x42d   :  { %275 = vadd.xlane.f32.xlu0 %v272_v11 }
 0x430   :  { %v261_v17 = vpop.permute.xlu0 %260 }
 0x431   :  { %vm265_vm7 = vcmp.eq.s32.totalorder %v261_v17, %v889_v5 }
 0x432   :  { %v716_v19 = vsel %vm265_vm7, 1.0, %v835_v20 }
 0x433   :  { %v271_v21 = vmul.f32 %v716_v19, %v1001_v48 }
 0x435   :  { %273 = vadd.xlane.f32.xlu1 %v271_v21 }
 0x443   :  { %280 = vperm.xlu0 %779, %v984_v37  }
 0x446   :  { %283 = vperm.xlu1 %780, %v992_v44  }
 0x447   :  { %782 = vset.pattern.permute.xlu0 %v834_v16 }
 0x44a   :  { %781 = vset.pattern.permute.xlu1 %v833_v15 }
 0x4b6   :  { %v276_v22 = vpop.xlane.xlu0 %275 }
 0x4b7   :  { %v278_v23 = vadd.f32 %v276_v22, %v258_v8 }
 0x4be   :  { %v281_v25 = vpop.permute.xlu0 %280  ;;  %v274_v26 = vpop.xlane.xlu1 %273 }
 0x4bf   :  { %vm285_vm8 = vcmp.eq.s32.totalorder %v281_v25, %v889_v5  ;;  %v277_v27 = vadd.f32 %v274_v26, %v257_v24 }
 0x4c0   :  { %v718_v28 = vsel %vm285_vm8, 1.0, %v835_v20 }
 0x4c1   :  { %v291_v29 = vmul.f32 %v718_v28, %v1001_v48 }
 0x4c2   :  { %v284_v30 = vpop.permute.xlu1 %283 }
 0x4c3   :  { %vm286_vm9 = vcmp.eq.s32.totalorder %v284_v30, %v889_v5  ;;  %293 = vadd.xlane.f32.xlu1 %v291_v29 }
 0x4c4   :  { %v719_v31 = vsel %vm286_vm9, 1.0, %v835_v20 }
 0x4c5   :  { %v292_v32 = vmul.f32 %v719_v31, %v1001_v48 }
 0x4c7   :  { %295 = vadd.xlane.f32.xlu0 %v292_v32 }
 0x4d4   :  { %300 = vperm.xlu1 %781, %v984_v37  }
 0x4d8   :  { %303 = vperm.xlu1 %781, %v992_v44  }
 0x4dc   :  { %783 = vset.pattern.permute.xlu1 %v834_v16 }
 0x54c   :  { %v294_v33 = vpop.xlane.xlu1 %293 }
 0x54d   :  { %v297_v34 = vadd.f32 %v294_v33, %v277_v27 }
 0x550   :  { %v301_v35 = vpop.permute.xlu1 %300  ;;  %v296_v42 = vpop.xlane.xlu0 %295 }
 0x551   :  { %vm305_vm10 = vcmp.eq.s32.totalorder %v301_v35, %v889_v5  ;;  %v298_v47 = vadd.f32 %v296_v42, %v278_v23 }
 0x552   :  { %v720_v36 = vsel %vm305_vm10, 1.0, %v835_v20 }
 0x553   :  { %v311_v38 = vmul.f32 %v720_v36, %v1001_v48 }
 0x554   :  { %v304_v39 = vpop.permute.xlu1 %303 }
 0x555   :  { %vm306_vm11 = vcmp.eq.s32.totalorder %v304_v39, %v889_v5  ;;  %313 = vadd.xlane.f32.xlu0 %v311_v38 }
 0x556   :  { %v721_v40 = vsel %vm306_vm11, 1.0, %v835_v20 }
 0x557   :  { %v312_v41 = vmul.f32 %v721_v40, %v1001_v48 }
 0x559   :  { %315 = vadd.xlane.f32.xlu1 %v312_v41 }
 0x56a   :  { %323 = vperm.xlu1 %783, %v992_v44  }
 0x56b   :  { %320 = vperm.xlu0 %782, %v984_v37  }
 0x56e   :  { %785 = vset.pattern.permute.xlu1 %v829_v1 }
 0x56f   :  { %784 = vset.pattern.permute.xlu0 %v836_v49 }
 0x5de   :  { %v314_v43 = vpop.xlane.xlu0 %313 }
 0x5df   :  { %v317_v45 = vadd.f32 %v314_v43, %v297_v34 }
 0x5e2   :  { %v316_v18 = vpop.xlane.xlu1 %315 }
 0x5e3   :  { %v318_v51 = vadd.f32 %v316_v18, %v298_v47 }
 0x5e6   :  { %v321_v52 = vpop.permute.xlu0 %320  ;;  %v324_v54 = vpop.permute.xlu1 %323 }
 0x5e7   :  { %vm325_vm12 = vcmp.eq.s32.totalorder %v321_v52, %v889_v5  ;;  %vm326_vm13 = vcmp.eq.s32.totalorder %v324_v54, %v889_v5 }
 0x5e8   :  { %v722_v55 = vsel %vm325_vm12, 1.0, %v835_v20  ;;  %v723_v56 = vsel %vm326_vm13, 1.0, %v835_v20 }
 0x5e9   :  { %v331_v57 = vmul.f32 %v722_v55, %v1001_v48  ;;  %v332_v58 = vmul.f32 %v723_v56, %v1001_v48 }
 0x5eb   :  { %333 = vadd.xlane.f32.xlu0 %v331_v57  ;;  %335 = vadd.xlane.f32.xlu1 %v332_v58 }
 0x5fc   :  { %385 = vperm.xlu1 %785, %v728_v59  }
 0x600   :  { %388 = vperm.xlu1 %785, %v729_v60  }
 0x601   :  { %340 = vperm.xlu0 %784, %v984_v37  }
 0x604   :  { %786 = vset.pattern.permute.xlu1 %v830_v3  ;;  %v556_v3 = vld [vmem:[%s1191_s4] sm:$0x3] }
 0x605   :  { %788 = vset.pattern.permute.xlu0 %v831_v13  ;;  %409 = vperm.xlu1 %786, %v728_v59  }
 0x606   :  { %432 = vperm.xlu0 %788, %v729_v60  }
 0x609   :  { %412 = vperm.xlu1 %786, %v729_v60  }
 0x60a   :  { %790 = vset.pattern.permute.xlu0 %v833_v15 }
 0x60b   :  { %469 = vperm.xlu0 %790, %v728_v59  }
 0x60d   :  { %787 = vset.pattern.permute.xlu1 %v831_v13 }
 0x60e   :  { %429 = vperm.xlu1 %787, %v728_v59  }
 0x60f   :  { %793 = vset.pattern.permute.xlu0 %v834_v16 }
 0x610   :  { %489 = vperm.xlu0 %793, %v728_v59  }
 0x612   :  { %789 = vset.pattern.permute.xlu1 %v832_v14 }
 0x613   :  { %449 = vperm.xlu1 %789, %v728_v59  }
 0x614   :  { %796 = vset.pattern.permute.xlu0 %v837_v50 }
 0x615   :  { %363 = vperm.xlu0 %796, %v992_v44  }
 0x617   :  { %452 = vperm.xlu1 %789, %v729_v60  }
 0x619   :  { %529 = vperm.xlu0 %796, %v728_v59  }
 0x61b   :  { %791 = vset.pattern.permute.xlu1 %v833_v15 }
 0x61c   :  { %472 = vperm.xlu1 %791, %v729_v60  }
 0x61d   :  { %799 = vset.pattern.permute.xlu0 %v829_v1 }
 0x61e   :  { %558 = vperm.xlu0 %799, %v556_v3  }
 0x620   :  { %792 = vset.pattern.permute.xlu1 %v836_v49 }
 0x621   :  { %343 = vperm.xlu1 %792, %v992_v44  }
 0x625   :  { %794 = vset.pattern.permute.xlu1 %v834_v16  ;;  %v1090_v16 = vld [vmem:[%s1192_s5 + $0x2] ss:$0 sm:$0xff] }
 0x626   :  { %492 = vperm.xlu1 %794, %v729_v60  }
 0x62a   :  { %795 = vset.pattern.permute.xlu1 %v837_v50 }
 0x62b   :  { %360 = vperm.xlu1 %795, %v984_v37  }
 0x62f   :  { %797 = vset.pattern.permute.xlu1 %v836_v49 }
 0x630   :  { %509 = vperm.xlu1 %797, %v728_v59  }
 0x634   :  { %512 = vperm.xlu1 %797, %v729_v60  }
 0x638   :  { %798 = vset.pattern.permute.xlu1 %v837_v50 }
 0x639   :  { %532 = vperm.xlu1 %798, %v729_v60  }
 0x63d   :  { %800 = vset.pattern.permute.xlu1 %v829_v1 }
 0x674   :  { %v334_v9 = vpop.xlane.xlu0 %333  ;;  %v336_v12 = vpop.xlane.xlu1 %335 }
 0x675   :  { %v1083_v13 = vadd.f32 %v334_v9, %v317_v45  ;;  %v1085_v14 = vadd.f32 %v336_v12, %v318_v51 }
 0x678   :  { %v386_v15 = vpop.permute.xlu1 %385 }
 0x679   :  { %vm390_vm14 = vcmp.eq.s32.totalorder %v386_v15, %v889_v5 }
 0x67a   :  { %v730_v49 = vsel %vm390_vm14, 1.0, %v835_v20 }
 0x67b   :  { %v400_v50 = vmul.f32 %v1090_v16, %v730_v49 }
 0x67c   :  { %v341_v37 = vpop.permute.xlu0 %340  ;;  %v389_v1 = vpop.permute.xlu1 %388 }
 0x67d   :  { %vm391_vm15 = vcmp.eq.s32.totalorder %v389_v1, %v889_v5  ;;  %402 = vadd.xlane.f32.xlu1 %v400_v50  ;;  %vm345_vm6 = vcmp.eq.s32.totalorder %v341_v37, %v889_v5  ;;  %v555_v50 = vld [vmem:[%s1189_s2] sm:$0x3] }
 0x67e   :  { %v731_v44 = vsel %vm391_vm15, 1.0, %v835_v20  ;;  %v724_v32 = vsel %vm345_vm6, 1.0, %v835_v20 }
 0x67f   :  { %v401_v61 = vmul.f32 %v1090_v16, %v731_v44  ;;  %v351_v34 = vmul.f32 %v724_v32, %v1001_v48 }
 0x680   :  { %v410_v62 = vpop.permute.xlu1 %409 }
 0x681   :  { %vm414_vm0 = vcmp.eq.s32.totalorder %v410_v62, %v889_v5  ;;  %404 = vadd.xlane.f32.xlu0 %v401_v61  ;;  %v433_v0 = vpop.permute.xlu0 %432  ;;  %v566_v61 = vshrl.u32 %v32_v4, 7  ;;  %v554_v62 = vld [vmem:[%s1190_s3] sm:$0x3] }
 0x682   :  { %v733_v63 = vsel %vm414_vm0, 1.0, %v835_v20  ;;  %vm435_vm1 = vcmp.eq.s32.totalorder %v433_v0, %v889_v5 }
 0x683   :  { %v420_v2 = vmul.f32 %v733_v63, %v1090_v16  ;;  %v736_v10 = vsel %vm435_vm1, 1.0, %v835_v20 }
 0x684   :  { %v413_v6 = vpop.permute.xlu1 %412  ;;  %v441_v19 = vmul.f32 %v736_v10, %v1090_v16 }
 0x685   :  { %vm415_vm2 = vcmp.eq.s32.totalorder %v413_v6, %v889_v5  ;;  %422 = vadd.xlane.f32.xlu1 %v420_v2  ;;  %v1160_v2 = vsub.s32 0, %v566_v61 }
 0x686   :  { %v734_v7 = vsel %vm415_vm2, 1.0, %v835_v20  ;;  %v470_v21 = vpop.permute.xlu0 %469 }
 0x687   :  { %v421_v8 = vmul.f32 %v734_v7, %v1090_v16  ;;  %vm474_vm4 = vcmp.eq.s32.totalorder %v470_v21, %v889_v5  ;;  %v1163_v7 = vsub.s32 1, %v566_v61 }
 0x688   :  { %v739_v26 = vsel %vm474_vm4, 1.0, %v835_v20  ;;  %vm602_vm4 = vcmask 58368  }
 0x689   :  { %424 = vadd.xlane.f32.xlu0 %v421_v8  ;;  %v430_v11 = vpop.permute.xlu1 %429  ;;  %v480_v30 = vmul.f32 %v739_v26, %v1090_v16 }
 0x68a   :  { %vm434_vm3 = vcmp.eq.s32.totalorder %v430_v11, %v889_v5 }
 0x68b   :  { %v735_v17 = vsel %vm434_vm3, 1.0, %v835_v20  ;;  %v490_v28 = vpop.permute.xlu0 %489  ;;  %vm599_vm3 = vcmask 1041409  }
 0x68c   :  { %v440_v22 = vmul.f32 %v735_v17, %v1090_v16  ;;  %vm494_vm8 = vcmp.eq.s32.totalorder %v490_v28, %v889_v5 }
 0x68d   :  { %444 = vadd.xlane.f32.xlu0 %v441_v19  ;;  %v741_v36 = vsel %vm494_vm8, 1.0, %v835_v20 }
 0x68e   :  { %442 = vadd.xlane.f32.xlu1 %v440_v22  ;;  %v450_v23 = vpop.permute.xlu1 %449  ;;  %v500_v40 = vmul.f32 %v741_v36, %v1090_v16 }
 0x68f   :  { %vm454_vm5 = vcmp.eq.s32.totalorder %v450_v23, %v889_v5 }
 0x690   :  { %v737_v24 = vsel %vm454_vm5, 1.0, %v835_v20  ;;  %v364_v42 = vpop.permute.xlu0 %363 }
 0x691   :  { %v460_v25 = vmul.f32 %v737_v24, %v1090_v16  ;;  %vm366_vm11 = vcmp.eq.s32.totalorder %v364_v42, %v889_v5 }
 0x692   :  { %v453_v27 = vpop.permute.xlu1 %452  ;;  %v727_v51 = vsel %vm366_vm11, 1.0, %v835_v20 }
 0x693   :  { %vm455_vm7 = vcmp.eq.s32.totalorder %v453_v27, %v889_v5  ;;  %462 = vadd.xlane.f32.xlu1 %v460_v25  ;;  %v372_v55 = vmul.f32 %v727_v51, %v1001_v48 }
 0x694   :  { %v738_v29 = vsel %vm455_vm7, 1.0, %v835_v20  ;;  %v530_v56 = vpop.permute.xlu0 %529 }
 0x695   :  { %v461_v31 = vmul.f32 %v738_v29, %v1090_v16  ;;  %vm534_vm14 = vcmp.eq.s32.totalorder %v530_v56, %v889_v5 }
 0x696   :  { %v745_v3 = vsel %vm534_vm14, 1.0, %v835_v20 }
 0x697   :  { %482 = vadd.xlane.f32.xlu1 %v480_v30  ;;  %464 = vadd.xlane.f32.xlu0 %v461_v31  ;;  %v473_v33 = vpop.permute.xlu1 %472 }
 0x698   :  { %vm475_vm9 = vcmp.eq.s32.totalorder %v473_v33, %v889_v5 }
 0x699   :  { %v740_v35 = vsel %vm475_vm9, 1.0, %v835_v20  ;;  %v559_v37 = vpop.permute.xlu0 %558 }
 0x69a   :  { %v481_v38 = vmul.f32 %v740_v35, %v1090_v16  ;;  %vm560_vm2 = vcmp.eq.s32.totalorder %v555_v50, %v559_v37 }
 0x69b   :  { %353 = vadd.xlane.f32.xlu1 %v351_v34  ;;  %v747_v63 = vsel %vm560_vm2, 1.0, %v835_v20 }
 0x69c   :  { %484 = vadd.xlane.f32.xlu0 %v481_v38  ;;  %v344_v39 = vpop.permute.xlu1 %343  ;;  %v563_v0 = vmul.f32 %v747_v63, %v554_v62 }
 0x69d   :  { %vm346_vm10 = vcmp.eq.s32.totalorder %v344_v39, %v889_v5 }
 0x69e   :  { %v725_v41 = vsel %vm346_vm10, 1.0, %v835_v20  ;;  %v568_v6 = vrot.slane %v563_v0, %v1160_v2 }
 0x69f   :  { %502 = vadd.xlane.f32.xlu1 %v500_v40  ;;  %v352_v43 = vmul.f32 %v725_v41, %v1001_v48 }
 0x6a1   :  { %355 = vadd.xlane.f32.xlu0 %v352_v43  ;;  %v493_v45 = vpop.permute.xlu1 %492 }
 0x6a2   :  { %vm495_vm12 = vcmp.eq.s32.totalorder %v493_v45, %v889_v5 }
 0x6a3   :  { %v742_v47 = vsel %vm495_vm12, 1.0, %v835_v20 }
 0x6a4   :  { %v501_v18 = vmul.f32 %v742_v47, %v1090_v16 }
 0x6a6   :  { %504 = vadd.xlane.f32.xlu0 %v501_v18  ;;  %v361_v52 = vpop.permute.xlu1 %360 }
 0x6a7   :  { %vm365_vm13 = vcmp.eq.s32.totalorder %v361_v52, %v889_v5 }
 0x6a8   :  { %v726_v54 = vsel %vm365_vm13, 1.0, %v835_v20 }
 0x6a9   :  { %v371_v57 = vmul.f32 %v726_v54, %v1001_v48  ;;  %v540_v48 = vmul.f32 %v745_v3, %v1090_v16 }
 0x6aa   :  { %375 = vadd.xlane.f32.xlu0 %v372_v55  ;;  %v551_v55 = vstv %s1193_s6  ;;  %s838_s6 = smov [#allocation3]  }
 0x6ab   :  { %373 = vadd.xlane.f32.xlu1 %v371_v57  ;;  %v510_v58 = vpop.permute.xlu1 %509  ;;  %s684_s17 = sshll.u32 %s838_s6, 4  ;;  %s685_s17 = int_to_ptr.vmem [resolvable:$true] %s684_s17 }
 0x6ac   :  { %vm514_vm15 = vcmp.eq.s32.totalorder %v510_v58, %v889_v5  ;;  %s807_s18 = scalar_lea.vmem %s685_s17, 32  ;;  %p812_p1 = scmp.lt.s32.totalorder %s685_s17, %s685_s17 }
 0x6ad   :  { %v743_v59 = vsel %vm514_vm15, 1.0, %v835_v20  ;;  %p808_p0 = scmp.ne.s32.totalorder %s685_s17, %s807_s18  ;;  %p813_p2 = scmp.lt.s32.totalorder %s807_s18, %s807_s18 }
 0x6ae   :  { %v520_v60 = vmul.f32 %v743_v59, %v1090_v16 }
 0x6af   :  { %v513_v9 = vpop.permute.xlu1 %512  ;;  %p814_p3 = por %p813_p2, %p812_p1 }
 0x6b0   :  { %vm515_vm0 = vcmp.eq.s32.totalorder %v513_v9, %v889_v5  ;;  %522 = vadd.xlane.f32.xlu1 %v520_v60 }
 0x6b1   :  { %v744_v12 = vsel %vm515_vm0, 1.0, %v835_v20  ;;  %p815_p4 = pnand %p814_p3, %p808_p0 }
 0x6b2   :  { %v521_v15 = vmul.f32 %v744_v12, %v1090_v16 }
 0x6b4   :  { %542 = vadd.xlane.f32.xlu1 %v540_v48  ;;  %524 = vadd.xlane.f32.xlu0 %v521_v15  ;;  %v533_v49 = vpop.permute.xlu1 %532 }
 0x6b5   :  { %vm535_vm1 = vcmp.eq.s32.totalorder %v533_v49, %v889_v5  ;;  %v593_v49 = vsub.s32 %v889_v5, %v566_v61 }
 0x6b6   :  { %v746_v1 = vsel %vm535_vm1, 1.0, %v835_v20 }
 0x6b7   :  { %v541_v44 = vmul.f32 %v746_v1, %v1090_v16  ;;  %v575_v16 = vrot.slane %v563_v0, %v1163_v7 }
 0x6b9   :  { %544 = vadd.xlane.f32.xlu0 %v541_v44 }
 0x6c5   :  { %570 = vbcast.lane.b32.xlu1 %v568_v6, 256 }
 0x6cf   :  { %577 = vbcast.lane.b32.xlu0 %v575_v16, 256 }
 0x706   :  { %v403_v8 = vpop.xlane.xlu1 %402 }
 0x70a   :  { %v405_v10 = vpop.xlane.xlu0 %404 }
 0x70e   :  { %v423_v4 = vpop.xlane.xlu1 %422 }
 0x70f   :  { %v426_v28 = vadd.f32 %v423_v4, %v403_v8 }
 0x712   :  { %v425_v11 = vpop.xlane.xlu0 %424 }
 0x713   :  { %v427_v39 = vadd.f32 %v425_v11, %v405_v10 }
 0x716   :  { %v445_v19 = vpop.xlane.xlu0 %444 }
 0x717   :  { %v443_v17 = vpop.xlane.xlu1 %442  ;;  %v447_v42 = vadd.f32 %v445_v19, %v427_v39 }
 0x718   :  { %v446_v32 = vadd.f32 %v443_v17, %v426_v28 }
 0x71c   :  { %v463_v21 = vpop.xlane.xlu1 %462 }
 0x71d   :  { %v466_v36 = vadd.f32 %v463_v21, %v446_v32 }
 0x720   :  { %v465_v22 = vpop.xlane.xlu0 %464  ;;  %v483_v20 = vpop.xlane.xlu1 %482 }
 0x721   :  { %v486_v41 = vadd.f32 %v483_v20, %v466_v36  ;;  %v467_v47 = vadd.f32 %v465_v22, %v447_v42 }
 0x724   :  { %v354_v24 = vpop.xlane.xlu1 %353 }
 0x725   :  { %v485_v23 = vpop.xlane.xlu0 %484  ;;  %v357_v30 = vadd.f32 %v354_v24, %v1083_v13 }
 0x728   :  { %v503_v27 = vpop.xlane.xlu1 %502 }
 0x729   :  { %v506_v45 = vadd.f32 %v503_v27, %v486_v41 }
 0x72a   :  { %v356_v25 = vpop.xlane.xlu0 %355 }
 0x72b   :  { %v358_v29 = vadd.f32 %v356_v25, %v1085_v14  ;;  %v487_v14 = vadd.f32 %v485_v23, %v467_v47 }
 0x72f   :  { %v505_v26 = vpop.xlane.xlu0 %504 }
 0x730   :  { %v507_v54 = vadd.f32 %v505_v26, %v487_v14 }
 0x733   :  { %v376_v31 = vpop.xlane.xlu0 %375 }
 0x734   :  { %v378_v33 = vadd.f32 %v376_v31, %v358_v29  ;;  %v374_v34 = vpop.xlane.xlu1 %373 }
 0x735   :  { %v377_v35 = vadd.f32 %v374_v34, %v357_v30 }
 0x736   :  { %v380_v38 = vadd.f32 %v378_v33, %v1009_v53 }
 0x737   :  { %v379_v40 = vadd.f32 %v377_v35, %v996_v46 }
 0x739   :  { %v523_v43 = vpop.xlane.xlu1 %522 }
 0x73a   :  { %v526_v18 = vadd.f32 %v523_v43, %v506_v45 }
 0x73d   :  { %v525_v51 = vpop.xlane.xlu0 %524  ;;  %v543_v13 = vpop.xlane.xlu1 %542 }
 0x73e   :  { %v546_v52 = vadd.f32 %v543_v13, %v526_v18  ;;  %v527_v53 = vadd.f32 %v525_v51, %v507_v54 }
 0x740   :  { %v548_v56 = vadd.f32 %v546_v52, %v379_v40 }
 0x741   :  { %v571_v57 = vpop.permute.xlu1 %570 }
 0x742   :  { %v545_v58 = vpop.xlane.xlu0 %544  ;;  %v552_v46 = vadd.f32 %v551_v55, %v548_v56 }
 0x743   :  { %v547_v59 = vadd.f32 %v545_v58, %v527_v53 }
 0x744   :  { %v581_v60 = vmul.f32 %v571_v57, %v552_v46 }
 0x745   :  { %v549_v3 = vadd.f32 %v547_v59, %v380_v38 }
 0x746   :  { %586 = vperm.xlu1 %800, %v581_v60   ;;  %v578_v12 = vpop.permute.xlu0 %577 }
 0x747   :  { %v553_v9 = vadd.f32 %v551_v55, %v549_v3 }
 0x749   :  { %v582_v48 = vmul.f32 %v578_v12, %v553_v9 }
 0x74b   :  { %589 = vperm.xlu1 %800, %v582_v48  }
 0x7c1   :  { %v587_v15 = vpop.permute.xlu1 %586 }
 0x7c2   :  { %v594_v37 = vrot.slane %v587_v15, %v593_v49 }
 0x7c6   :  { %v590_v50 = vpop.permute.xlu1 %589 }
 0x7c7   :  { %v598_v1 = vrot.slane %v590_v50, %v593_v49 }
 0x7c9   :  { %v600_v44 = vsel %vm599_vm3, %v598_v1, %v594_v37 }
 0x7ca   :  { %v603_v62 = vsel %vm602_vm4, %v600_v44, -inf }
 0x7cb   :  { %604 = vmax.xlane.f32.xlu0 %v603_v62 }
 0x854   :  { %v605_v63 = vpop.xlane.xlu0 %604 }
 0x855   :  { %v610_v0 = vrot.slane %v605_v63, %v1160_v2  ;;  %v614_v6 = vrot.slane %v605_v63, %v1163_v7 }
 0x857   :  { %v617_v16 = vsub.f32 %v581_v60, %v610_v0  ;;  %v618_v8 = vsub.f32 %v582_v48, %v614_v6 }
 0x859   :  { %v619_v10 = vmul.f32 1.442695, %v617_v16  ;;  %v621_v5 = vmul.f32 1.442695, %v618_v8 }
 0x85b   :  { %801 = vpow2.f32 %v619_v10 }
 0x85c   :  { %803 = vpow2.f32 %v621_v5 }
 0x868   :  { %v802_v61 = vpop.eup %801 }
 0x869   :  { %626 = vperm.xlu1 %800, %v802_v61   ;;  %v804_v4 = vpop.eup %803 }
 0x86d   :  { %629 = vperm.xlu1 %800, %v804_v4  }
 0x8e4   :  { %v627_v11 = vpop.permute.xlu1 %626 }
 0x8e5   :  { %v634_v19 = vrot.slane %v627_v11, %v593_v49 }
 0x8e8   :  { %v630_v17 = vpop.permute.xlu1 %629 }
 0x8e9   :  { %v638_v21 = vrot.slane %v630_v17, %v593_v49 }
 0x8eb   :  { %v639_v22 = vsel %vm599_vm3, %v638_v21, %v634_v19 }
 0x8ec   :  { %v641_v20 = vsel %vm602_vm4, %v639_v22, 0.0 }
 0x8ed   :  { %642 = vadd.xlane.f32.xlu1 %v641_v20 }
 0x976   :  { %v643_v23 = vpop.xlane.xlu1 %642 }
 0x977   :  { %805 = vlog2.f32 %v643_v23 }
 0x984   :  { %v806_v24 = vpop.eup %805 }
 0x985   :  { %v645_v25 = vmul.f32 0.6931472, %v806_v24 }
 0x987   :  { %v654_v26 = vrot.slane %v645_v25, %v1163_v7  ;;  %v650_v27 = vrot.slane %v645_v25, %v1160_v2 }
 0x989   :  { %v658_v28 = vsub.f32 %v618_v8, %v654_v26  ;;  %v657_v29 = vsub.f32 %v617_v16, %v650_v27 }
 0x98b   :  { %665 = vperm.xlu1 %800, %v658_v28   ;;  %662 = vperm.xlu0 %799, %v657_v29  }
 0xa06   :  { %v666_v30 = vpop.permute.xlu1 %665  ;;  %v663_v31 = vpop.permute.xlu0 %662 }
 0xa07   :  { %v674_v32 = vrot.slane %v666_v30, %v593_v49  ;;  %v670_v33 = vrot.slane %v663_v31, %v593_v49 }
 0xa09   :  { %v675_v34 = vsel %vm599_vm3, %v674_v32, %v670_v33 }
 0xa0a   :  { %677 = vst.msk [vmem:[#allocation3] sm:$0x3] %vm602_vm4, %v675_v34 }
 0xa0b   :  { %818 = shalt.err (!%p815_p4)
}
 0xa0c   :  { %687 = dma.vmem_to_hbm [thread:$0]  %s685_s17, 32, %s1194_s7, [#allocation4]  }
 0xa0d   :  { %827 = dma.done.wait [#allocation4], 32  }
 0xa0e   :  { %828 = vsyncadd [#allocation4], 4294967264 }
 0xa0f   :  { %691 = vsyncpa [#allocation4], 1 }

</bundles_post_ra>
